<compile_context>
chip_gen: v6e
topology: v6e:2x2x1
jax: 0.10.0
libtpu: 0.0.40
codegen_flags: <defaults>
</compile_context>

<pallas_src>
import functools

import jax
import jax.numpy as jnp
from jax import lax
from jax.experimental import pallas as pl
from jax.experimental.pallas import tpu as pltpu


def _round_up(x, m):
    return ((x + m - 1) // m) * m


def _pad_rows(x, rows):
    pad = rows - x.shape[0]
    if pad == 0:
        return x
    return jnp.pad(x, ((0, pad), (0, 0)))  # zero rows: contribute exp(0)=1 exactly


def _ntxent_kernel(zi_ref, zj_ref, zk_ref, out_ref, row_sum_ref, *,
                   temperature, n_valid, m_real, m_pad):
    """One (TM, TK) tile of exp((z_i/T) @ z_cat^T); finalize loss at last key tile.

    zi_ref : (TM, D)  query rows (z_i)
    zj_ref : (TM, D)  matching z_j rows (for the positive pairs)
    zk_ref : (TK, D)  key rows (a tile of cat([z_i, z_j]))
    out_ref: (1, 1)   partial loss sum for this row tile
    row_sum_ref: (TM, 1) VMEM accumulator across key tiles
    """
    i = pl.program_id(0)
    k = pl.program_id(1)

    @pl.when(k == 0)
    def _():
        row_sum_ref[...] = jnp.zeros_like(row_sum_ref)

    inv_t = jnp.float32(1.0 / temperature)
    # Fold temperature into the small (TM, D) LHS tile instead of dividing the
    # (TM, TK) similarity tile.
    zi_scaled = zi_ref[...].astype(jnp.float32) * inv_t          # (TM, D)
    zk = zk_ref[...].astype(jnp.float32)                         # (TK, D)

    # A @ B^T directly on the MXU: contract last dims of both operands.
    logits = lax.dot_general(
        zi_scaled, zk, (((1,), (1,)), ((), ())),
        precision=lax.Precision.HIGHEST,
        preferred_element_type=jnp.float32)                      # (TM, TK)
    sim = jnp.exp(logits)                                        # EUP
    row_sum_ref[...] += jnp.sum(sim, axis=1, keepdims=True)      # XLU reduce

    @pl.when(k == pl.num_programs(1) - 1)
    def _():
        tm = zi_ref.shape[0]
        zi = zi_ref[...].astype(jnp.float32)
        zj = zj_ref[...].astype(jnp.float32)
        # Direct diag / positive similarities — no (2N, 2N) iota masks needed.
        diag = jnp.exp(jnp.sum(zi * zi, axis=1, keepdims=True) * inv_t)  # sim[i, i]
        pos = jnp.exp(jnp.sum(zi * zj, axis=1, keepdims=True) * inv_t)   # sim[i, i+N]
        # Zero-padded key rows each contributed exp(0) == 1 exactly; remove them.
        row_sum = row_sum_ref[...] - jnp.float32(m_pad - m_real)
        neg = (row_sum - 2.0 * diag) / jnp.float32(m_real - 2)
        per_row = -jnp.log(pos / (pos + neg + 1e-8))                     # (TM, 1)
        # Drop zero-padded query rows from this tile's partial sum.
        row_id = i * tm + lax.broadcasted_iota(jnp.int32, (tm, 1), 0)
        valid = row_id < n_valid
        out_ref[...] = jnp.sum(jnp.where(valid, per_row, 0.0), keepdims=True)


def contrastive_loss_pallas(z_i, z_j, temperature=0.5, *,
                            tm_target=256, tk_target=512):
    """z_i, z_j: (N, D) float32. Returns scalar float32 NT-Xent loss."""
    assert z_i.shape == z_j.shape and z_i.ndim == 2
    n, d = z_i.shape
    m = 2 * n

    z_i = z_i.astype(jnp.float32)
    z_j = z_j.astype(jnp.float32)
    # Keys keep the concat (one (2N, D) pass); the expensive (N x 2N) work uses
    # z_i directly as the LHS, so no concatenated LHS is ever materialized.
    z_cat = jnp.concatenate([z_i, z_j], axis=0)

    # Row (query) tiling -> "parallel" grid axis; key tiling -> "arbitrary" reduction.
    tm = min(tm_target, _round_up(n, 8))
    n_pad = _round_up(n, tm)
    tk = min(tk_target, _round_up(m, 8))
    m_pad = _round_up(m, tk)

    zi_p = _pad_rows(z_i, n_pad)
    zj_p = _pad_rows(z_j, n_pad)
    zk_p = _pad_rows(z_cat, m_pad)

    grid = (n_pad // tm, m_pad // tk)
    kernel = functools.partial(
        _ntxent_kernel,
        temperature=float(temperature), n_valid=n, m_real=m, m_pad=m_pad)

    partials = pl.pallas_call(
        kernel,
        out_shape=jax.ShapeDtypeStruct((grid[0], 1), jnp.float32),
        grid=grid,
        in_specs=[
            pl.BlockSpec((tm, d), lambda i, k: (i, 0)),   # z_i rows
            pl.BlockSpec((tm, d), lambda i, k: (i, 0)),   # z_j rows (positives)
            pl.BlockSpec((tk, d), lambda i, k: (k, 0)),   # keys: cat([z_i, z_j])
        ],
        out_specs=pl.BlockSpec((1, 1), lambda i, k: (i, 0)),
        scratch_shapes=[pltpu.VMEM((tm, 1), jnp.float32)],
        compiler_params=pltpu.CompilerParams(
            dimension_semantics=("parallel", "arbitrary")),
    )(zi_p, zj_p, zk_p)

    return jnp.sum(partials) / jnp.float32(n)


def _reference_loss(z_i, z_j, temperature=0.5):
    """Pure-JAX reference mirroring the PyTorch forward exactly."""
    z = jnp.concatenate([z_i, z_j], axis=0)
    m = z.shape[0]
    n = m // 2
    sim = jnp.exp(jnp.matmul(z, z.T, precision=lax.Precision.HIGHEST) / temperature)
    pos = jnp.diagonal(sim, offset=n)                              # (N,)
    neg = (sim.sum(axis=1) - 2.0 * jnp.diagonal(sim)) / (m - 2)
    neg = neg[:n]
    return jnp.mean(-jnp.log(pos / (pos + neg + 1e-8)))


if __name__ == "__main__":
    key = jax.random.PRNGKey(0)
    k1, k2 = jax.random.split(key)
    N, D = 8, 32                        # small shapes: batch=8, hidden=32
    z_i = jax.random.normal(k1, (N, D), dtype=jnp.float32)
    z_j = jax.random.normal(k2, (N, D), dtype=jnp.float32)
    # The loss consumes projection-head embeddings; normalize rows (SimCLR-style)
    # so exp(z.z/T) stays inside f32 range. Un-normalized random draws overflow
    # to inf and make BOTH the PyTorch module and any faithful port NaN.
    z_i = z_i / jnp.linalg.norm(z_i, axis=1, keepdims=True)
    z_j = z_j / jnp.linalg.norm(z_j, axis=1, keepdims=True)

    loss = jax.block_until_ready(contrastive_loss_pallas(z_i, z_j, temperature=0.5))
    ref = jax.block_until_ready(_reference_loss(z_i, z_j, temperature=0.5))

    # Tolerance covers MXU matmul-pass precision differences vs the XLA reference.
    ok = bool(jnp.isfinite(loss)) and bool(
        jnp.allclose(loss, ref, rtol=2e-3, atol=2e-3))
    assert ok, (loss, ref)
    print("KERNEL_OK")
</pallas_src>

<mosaic_0001>
module attributes {stable_mosaic.version = 11 : i64} {
  func.func @_ntxent_kernel(%arg0: i32, %arg1: i32, %arg2: memref<8x32xf32, #tpu.memory_space<vmem>>, %arg3: memref<8x32xf32, #tpu.memory_space<vmem>>, %arg4: memref<16x32xf32, #tpu.memory_space<vmem>>, %arg5: memref<1x1xf32, #tpu.memory_space<vmem>>, %arg6: memref<8x1xf32, #tpu.memory_space<vmem>>) attributes {dimension_semantics = [#tpu.dimension_semantics<parallel>, #tpu.dimension_semantics<arbitrary>], iteration_bounds = array<i64: 1, 1>, scalar_prefetch = 0 : i64, scratch_operands = 1 : i64, tpu.core_type = #tpu.core_type<tc>, window_params = [{transform_indices = @transform_0, window_bounds = array<i64: 8, 32>}, {transform_indices = @transform_1, window_bounds = array<i64: 8, 32>}, {transform_indices = @transform_2, window_bounds = array<i64: 16, 32>}, {transform_indices = @transform_3, window_bounds = array<i64: 1, 1>}]} {
    %c0_i32 = arith.constant 0 : i32
    %0 = arith.cmpi eq, %arg1, %c0_i32 : i32
    %1 = arith.extui %0 : i1 to i32
    %c0_i32_0 = arith.constant 0 : i32
    %2 = arith.cmpi ne, %1, %c0_i32_0 : i32
    scf.if %2 {
      %cst_13 = arith.constant 0.000000e+00 : f32
      %17 = vector.broadcast %cst_13 : f32 to vector<8x1xf32>
      %c0_14 = arith.constant 0 : index
      %c0_15 = arith.constant 0 : index
      %18 = vector.load %arg6[%c0_14, %c0_15] : memref<8x1xf32, #tpu.memory_space<vmem>>, vector<8x1xf32>
      tpu.vector_store %arg6[%c0_14, %c0_15], %17 {strides = array<i32>} : memref<8x1xf32, #tpu.memory_space<vmem>>, vector<8x1xf32>,
    } else {
    }
    %c0 = arith.constant 0 : index
    %c0_1 = arith.constant 0 : index
    %3 = vector.load %arg2[%c0, %c0_1] : memref<8x32xf32, #tpu.memory_space<vmem>>, vector<8x32xf32>
    %cst = arith.constant 2.000000e+00 : f32
    %4 = vector.broadcast %cst : f32 to vector<8x32xf32>
    %5 = arith.mulf %3, %4 : vector<8x32xf32>
    %c0_2 = arith.constant 0 : index
    %c0_3 = arith.constant 0 : index
    %6 = vector.load %arg4[%c0_2, %c0_3] : memref<16x32xf32, #tpu.memory_space<vmem>>, vector<16x32xf32>
    %cst_4 = arith.constant dense<0.000000e+00> : vector<8x16xf32>
    %7 = tpu.matmul %5, %6, %cst_4 {dimension_numbers = #tpu.dot_dimension_numbers<[1], [1], [0], [0], [0, 0, 1, 0], [], []>, precision = #tpu.contract_precision<fp32>} : vector<8x32xf32>, vector<16x32xf32>, vector<8x16xf32> -> vector<8x16xf32>
    %8 = math.exp %7 : vector<8x16xf32>
    %c0_5 = arith.constant 0 : index
    %c0_6 = arith.constant 0 : index
    %9 = vector.load %arg6[%c0_5, %c0_6] : memref<8x1xf32, #tpu.memory_space<vmem>>, vector<8x1xf32>
    %cst_7 = arith.constant dense<0.000000e+00> : vector<8xf32>
    %10 = vector.multi_reduction <add>, %8, %cst_7 [1] : vector<8x16xf32> to vector<8xf32>
    %11 = vector.shape_cast %10 : vector<8xf32> to vector<8x1xf32>
    %12 = arith.addf %9, %11 : vector<8x1xf32>
    %c0_8 = arith.constant 0 : index
    %c0_9 = arith.constant 0 : index
    %13 = vector.load %arg6[%c0_8, %c0_9] : memref<8x1xf32, #tpu.memory_space<vmem>>, vector<8x1xf32>
    tpu.vector_store %arg6[%c0_8, %c0_9], %12 {strides = array<i32>} : memref<8x1xf32, #tpu.memory_space<vmem>>, vector<8x1xf32>,
    %c0_i32_10 = arith.constant 0 : i32
    %14 = arith.cmpi eq, %arg1, %c0_i32_10 : i32
    %15 = arith.extui %14 : i1 to i32
    %cst_11 = arith.constant 2.000000e+00 : f32
    %c0_i32_12 = arith.constant 0 : i32
    %16 = arith.cmpi ne, %15, %c0_i32_12 : i32
    scf.if %16 {
      %c0_13 = arith.constant 0 : index
      %c0_14 = arith.constant 0 : index
      %17 = vector.load %arg2[%c0_13, %c0_14] : memref<8x32xf32, #tpu.memory_space<vmem>>, vector<8x32xf32>
      %c0_15 = arith.constant 0 : index
      %c0_16 = arith.constant 0 : index
      %18 = vector.load %arg3[%c0_15, %c0_16] : memref<8x32xf32, #tpu.memory_space<vmem>>, vector<8x32xf32>
      %19 = arith.mulf %17, %17 : vector<8x32xf32>
      %cst_17 = arith.constant dense<0.000000e+00> : vector<8xf32>
      %20 = vector.multi_reduction <add>, %19, %cst_17 [1] : vector<8x32xf32> to vector<8xf32>
      %21 = vector.shape_cast %20 : vector<8xf32> to vector<8x1xf32>
      %22 = vector.broadcast %cst_11 : f32 to vector<8x1xf32>
      %23 = arith.mulf %21, %22 : vector<8x1xf32>
      %24 = math.exp %23 : vector<8x1xf32>
      %25 = arith.mulf %17, %18 : vector<8x32xf32>
      %cst_18 = arith.constant dense<0.000000e+00> : vector<8xf32>
      %26 = vector.multi_reduction <add>, %25, %cst_18 [1] : vector<8x32xf32> to vector<8xf32>
      %27 = vector.shape_cast %26 : vector<8xf32> to vector<8x1xf32>
      %28 = vector.broadcast %cst_11 : f32 to vector<8x1xf32>
      %29 = arith.mulf %27, %28 : vector<8x1xf32>
      %30 = math.exp %29 : vector<8x1xf32>
      %c0_19 = arith.constant 0 : index
      %c0_20 = arith.constant 0 : index
      %31 = vector.load %arg6[%c0_19, %c0_20] : memref<8x1xf32, #tpu.memory_space<vmem>>, vector<8x1xf32>
      %cst_21 = arith.constant 0.000000e+00 : f32
      %32 = vector.broadcast %cst_21 : f32 to vector<8x1xf32>
      %33 = arith.subf %31, %32 : vector<8x1xf32>
      %cst_22 = arith.constant 2.000000e+00 : f32
      %34 = vector.broadcast %cst_22 : f32 to vector<8x1xf32>
      %35 = arith.mulf %34, %24 : vector<8x1xf32>
      %36 = arith.subf %33, %35 : vector<8x1xf32>
      %cst_23 = arith.constant 1.400000e+01 : f32
      %37 = vector.broadcast %cst_23 : f32 to vector<8x1xf32>
      %38 = arith.divf %36, %37 : vector<8x1xf32>
      %39 = arith.addf %30, %38 : vector<8x1xf32>
      %cst_24 = arith.constant 9.99999993E-9 : f32
      %40 = vector.broadcast %cst_24 : f32 to vector<8x1xf32>
      %41 = arith.addf %39, %40 : vector<8x1xf32>
      %42 = arith.divf %30, %41 : vector<8x1xf32>
      %43 = math.log %42 : vector<8x1xf32>
      %cst_25 = arith.constant 0.000000e+00 : f32
      %44 = vector.broadcast %cst_25 : f32 to vector<8x1xf32>
      %45 = arith.subf %44, %43 : vector<8x1xf32>
      %c8_i32 = arith.constant 8 : i32
      %46 = arith.muli %arg0, %c8_i32 : i32
      %47 = tpu.iota {dimensions = array<i32: 0>} : vector<8x1xi32>
      %48 = vector.broadcast %46 : i32 to vector<8x1xi32>
      %49 = arith.addi %48, %47 : vector<8x1xi32>
      %c8_i32_26 = arith.constant 8 : i32
      %50 = vector.broadcast %c8_i32_26 : i32 to vector<8x1xi32>
      %51 = arith.cmpi slt, %49, %50 : vector<8x1xi32>
      %cst_27 = arith.constant 0.000000e+00 : f32
      %52 = vector.broadcast %cst_27 : f32 to vector<8x1xf32>
      %53 = arith.select %51, %45, %52 : vector<8x1xi1>, vector<8x1xf32>
      %54 = vector.shape_cast %53 : vector<8x1xf32> to vector<1x8x1xf32>
      %cst_28 = arith.constant dense<0.000000e+00> : vector<1xf32>
      %55 = vector.multi_reduction <add>, %54, %cst_28 [1, 2] : vector<1x8x1xf32> to vector<1xf32>
      %56 = vector.shape_cast %55 : vector<1xf32> to vector<1x1x1xf32>
      %57 = vector.extract %56[0, 0, 0] : f32 from vector<1x1x1xf32>
      %58 = vector.broadcast %57 : f32 to vector<1x1xf32>
      %c0_29 = arith.constant 0 : index
      %c0_30 = arith.constant 0 : index
      %59 = vector.load %arg5[%c0_29, %c0_30] : memref<1x1xf32, #tpu.memory_space<vmem>>, vector<1x1xf32>
      tpu.vector_store %arg5[%c0_29, %c0_30], %58 {strides = array<i32>} : memref<1x1xf32, #tpu.memory_space<vmem>>, vector<1x1xf32>,
    } else {
    }
    return
  }
  func.func @transform_0(%arg0: i32, %arg1: i32) -> (i32, i32) {
    %c0_i32 = arith.constant 0 : i32
    %c0_i32_0 = arith.constant 0 : i32
    return %arg0, %c0_i32 : i32, i32
  }
  func.func @transform_1(%arg0: i32, %arg1: i32) -> (i32, i32) {
    %c0_i32 = arith.constant 0 : i32
    %c0_i32_0 = arith.constant 0 : i32
    return %arg0, %c0_i32 : i32, i32
  }
  func.func @transform_2(%arg0: i32, %arg1: i32) -> (i32, i32) {
    %c0_i32 = arith.constant 0 : i32
    %c0_i32_0 = arith.constant 0 : i32
    return %arg1, %c0_i32 : i32, i32
  }
  func.func @transform_3(%arg0: i32, %arg1: i32) -> (i32, i32) {
    %c0_i32 = arith.constant 0 : i32
    %c0_i32_0 = arith.constant 0 : i32
    return %arg0, %c0_i32 : i32, i32
  }
}

</mosaic_0001>

<bundles_post_ra>
// kernel: tpu_custom_call.1
= control target key start
LH: loop header
LB: loop body
LE: loop exit
PB: predicated region body
PF: predicated region fallthrough
CT: control target
= control target key end

     0   :  { %8 = vsyncpa [#allocation4], 0  ;;  %s847_s0 = inlined_call_operand.hbm [shape: f32[8,32], index: 0, kind: input, shape index: {}]   ;;  %s848_s1 = inlined_call_operand.hbm [shape: f32[8,32], index: 1, kind: input, shape index: {}]   ;;  %s849_s2 = inlined_call_operand.hbm [shape: f32[16,32], index: 2, kind: input, shape index: {}]   ;;  %s850_s3 = inlined_call_operand.hbm [shape: f32[1,1], index: 3, kind: output, shape index: {}]  }
   0x1   :  { %9 = vsyncpa [#allocation7], 0 }
   0x2   :  { %10 = vsyncpa [#allocation5], 0  ;;  %s774_s12 = smov [#allocation6]   ;;  %s775_s14 = smov [#allocation3]  }
   0x3   :  { %s27_s13 = sshll.u32 %s774_s12, 4  ;;  %s17_s15 = sshll.u32 %s775_s14, 4  ;;  %s28_s13 = int_to_ptr.vmem [resolvable:$true] %s27_s13  ;;  %s18_s15 = int_to_ptr.vmem [resolvable:$true] %s17_s15 }
   0x4   :  { %s696_s16 = scalar_lea.vmem %s28_s13, 128  ;;  %p701_p1 = scmp.lt.s32.totalorder %s28_s13, %s28_s13 }
   0x5   :  { %p697_p0 = scmp.ne.s32.totalorder %s28_s13, %s696_s16  ;;  %p702_p2 = scmp.lt.s32.totalorder %s696_s16, %s696_s16 }
   0x7   :  { %p703_p3 = por %p702_p2, %p701_p1 }
   0x9   :  { %p704_p4 = pnand %p703_p3, %p697_p0 }
   0xb   :  { %707 = shalt.err (!%p704_p4)
}
   0xc   :  { %30 = dma.hbm_to_vmem [thread:$0]  %s848_s1, 128, %s28_s13, [#allocation7]  }
   0xd   :  { %s716_s19 = scalar_lea.vmem %s18_s15, 128  ;;  %p721_p6 = scmp.lt.s32.totalorder %s18_s15, %s18_s15 }
   0xe   :  { %p717_p5 = scmp.ne.s32.totalorder %s18_s15, %s716_s19  ;;  %p722_p7 = scmp.lt.s32.totalorder %s716_s19, %s716_s19 }
  0x10   :  { %p723_p8 = por %p722_p7, %p721_p6 }
  0x12   :  { %p724_p9 = pnand %p723_p8, %p717_p5 }
  0x14   :  { %727 = shalt.err (!%p724_p9)
}
  0x15   :  { %20 = dma.hbm_to_vmem [thread:$0]  %s847_s0, 128, %s18_s15, [#allocation4]  }
  0x16   :  { %s776_s22 = smov [#allocation8]  }
  0x17   :  { %s36_s23 = sshll.u32 %s776_s22, 4  ;;  %s37_s23 = int_to_ptr.vmem [resolvable:$true] %s36_s23 }
  0x18   :  { %s736_s24 = scalar_lea.vmem %s37_s23, 256  ;;  %p741_p11 = scmp.lt.s32.totalorder %s37_s23, %s37_s23 }
  0x19   :  { %p737_p10 = scmp.ne.s32.totalorder %s37_s23, %s736_s24  ;;  %p742_p12 = scmp.lt.s32.totalorder %s736_s24, %s736_s24 }
  0x1b   :  { %p743_p13 = por %p742_p12, %p741_p11 }
  0x1d   :  { %p744_p0 = pnand %p743_p13, %p737_p10 }
  0x1f   :  { %747 = shalt.err (!%p744_p0)
}
  0x20   :  { %s777_s1 = smov 128   ;;  %s778_s25 = smov 8  }
  0x21   :  { %42 = dma.hbm_to_vmem [thread:$0]  %s849_s2, 256, %s37_s23, [#allocation7], %s777_s1, %s777_s1, %s778_s25  }
  0x22   :  { %768 = dma.done.wait [#allocation4], 128  }
  0x23   :  { %769 = vsyncadd [#allocation4], 4294967168 }
  0x24   :  { %770 = dma.done.wait [#allocation7], 384  }
  0x25   :  { %771 = vsyncadd [#allocation7], 4294966912  ;;  %v779_v0 = vmov 0.0   ;;  %vm780_vm0 = vmmov 0   ;;  %vm62_vm1 = vcmask 261120   ;;  %v61_v1 = vld [vmem:[#allocation8 + $0x8] sm:$0xff] }
  0x26   :  { %626 = vmatprep.subr.mxu0 %v779_v0  ;;  %633 = vmatprep.subr.mxu1 %v779_v0  ;;  %v60_v2 = vld [vmem:[#allocation8] sm:$0xff]  ;;  %v58_v3 = vld [vmem:[#allocation3] sm:$0xff]  ;;  %v70_v4 = vsel %vm62_vm1, %v61_v1, 0  ;;  %v545_v24 = vld [vmem:[#allocation6] sm:$0xff]  ;;  %vm56_vm2 = vcmask 7168   ;;  %vm534_vm3 = vcmask 130048  }
  0x27   :  { %630 = vmatprep.mubr.msk.f32.mxu0 %vm780_vm0, %v779_v0  ;;  %637 = vmatprep.mubr.msk.f32.mxu1 %vm780_vm0, %v779_v0  ;;  %v67_v5 = vsel %vm62_vm1, %v60_v2, 0  ;;  %v59_v6 = vmul.f32 2.0, %v58_v3  ;;  %v101_v7 = vand.u32 4294901760, %v70_v4  ;;  %v546_v23 = vmul.f32 %v58_v3, %v58_v3  ;;  %57 = vst.msk [vmem:[#allocation2] sm:$0xff] %vm56_vm2, %v779_v0  ;;  %s781_s0 = smov [#allocation9]  }
  0x28   :  { %v104_v8 = vand.u32 4294901760, %v67_v5  ;;  %v553_v25 = vmul.f32 %v545_v24, %v58_v3  ;;  %s598_s2 = sshll.u32 %s781_s0, 4  ;;  %vm590_vm4 = vcmask 0   ;;  %s599_s2 = int_to_ptr.vmem [resolvable:$true] %s598_s2 }
  0x29   :  { %v64_v9 = vsel %vm62_vm1, %v59_v6, 0  ;;  %627 = vmatpush3.xpose.msra.mxu0 %v101_v7  ;;  %v179_v10 = vsub.f32 %v70_v4, %v101_v7  ;;  %v547_v26 = vsel %vm62_vm1, %v546_v23, 0.0  ;;  %s748_s29 = scalar_lea.vmem %s599_s2, 16  ;;  %s752_s30 = scalar_lea.vmem %s599_s2, 32 }
  0x2a   :  { %v139_v11 = vand.u32 4294901760, %v64_v9  ;;  %v186_v12 = vsub.f32 %v67_v5, %v104_v8  ;;  %628 = vmatprep.subr.mxu0 %v779_v0  ;;  %548 = vadd.xlane.f32.xlu0 %v547_v26  ;;  %v554_v27 = vsel %vm62_vm1, %v553_v25, 0.0  ;;  %p749_p1 = scmp.ne.s32.totalorder %s599_s2, %s748_s29  ;;  %p753_p2 = scmp.lt.s32.totalorder %s599_s2, %s599_s2 }
  0x2b   :  { %v180_v13 = vand.u32 4294901760, %v179_v10  ;;  %p754_p3 = scmp.lt.s32.totalorder %s752_s30, %s748_s29 }
  0x2c   :  { %v140_v14 = vsub.f32 %v64_v9, %v139_v11  ;;  %v187_v15 = vand.u32 4294901760, %v186_v12 }
  0x2d   :  { %629 = vmatpush3.xpose.msra.mxu0 %v104_v8  ;;  %v181_v16 = vsub.f32 %v179_v10, %v180_v13  ;;  %p755_p4 = por %p754_p3, %p753_p2 }
  0x2e   :  { %v141_v17 = vand.u32 4294901760, %v140_v14  ;;  %v188_v18 = vsub.f32 %v186_v12, %v187_v15  ;;  %640 = vmatprep.subr.mxu0 %v779_v0  ;;  %555 = vadd.xlane.f32.xlu0 %v554_v27  ;;  %v533_v54 = vld [vmem:[#allocation2] sm:$0xff] }
  0x2f   :  { %v182_v19 = vand.u32 4294901760, %v181_v16  ;;  %p756_p5 = pnand %p755_p4, %p749_p1 }
  0x30   :  { %v142_v20 = vsub.f32 %v140_v14, %v141_v17  ;;  %v189_v22 = vand.u32 4294901760, %v188_v18 }
  0x31   :  { %634 = vmatpush3.xpose.msra.mxu1 %v182_v19 }
  0x32   :  { %v143_v21 = vand.u32 4294901760, %v142_v20  ;;  %635 = vmatprep.subr.mxu1 %v779_v0 }
  0x34   :  { %631 = vmatmul.mubr.f32.vlgmr.msra.gmra.mxu0 %v143_v21 }
  0x35   :  { %641 = vmatpush3.xpose.msra.mxu0 %v179_v10  ;;  %644 = vmatprep.mubr.msk.f32.mxu0 %vm780_vm0, %v779_v0 }
  0x36   :  { %636 = vmatpush3.xpose.msra.mxu1 %v189_v22  ;;  %642 = vmatprep.subr.mxu0 %v779_v0 }
  0x37   :  { %647 = vmatprep.subr.mxu1 %v779_v0 }
  0x39   :  { %643 = vmatpush3.xpose.msra.mxu0 %v186_v12  ;;  %638 = vmatmul.mubr.f32.vlgmr.msra.gmra.mxu1 %v139_v11 }
  0x3a   :  { %648 = vmatpush3.xpose.msra.mxu1 %v101_v7  ;;  %654 = vmatprep.subr.mxu0 %v779_v0 }
  0x3b   :  { %649 = vmatprep.subr.mxu1 %v779_v0  ;;  %651 = vmatprep.mubr.msk.f32.mxu1 %vm780_vm0, %v779_v0 }
  0x3c   :  { %645 = vmatmul.mubr.f32.vlgmr.msra.gmra.mxu0 %v140_v14 }
  0x3d   :  { %655 = vmatpush3.xpose.msra.mxu0 %v180_v13  ;;  %658 = vmatprep.mubr.msk.f32.mxu0 %vm780_vm0, %v779_v0 }
  0x3e   :  { %650 = vmatpush3.xpose.msra.mxu1 %v104_v8  ;;  %656 = vmatprep.subr.mxu0 %v779_v0 }
  0x3f   :  { %661 = vmatprep.subr.mxu1 %v779_v0 }
  0x41   :  { %657 = vmatpush3.xpose.msra.mxu0 %v187_v15  ;;  %652 = vmatmul.mubr.f32.vlgmr.msra.gmra.mxu1 %v141_v17 }
  0x42   :  { %662 = vmatpush3.xpose.msra.mxu1 %v101_v7  ;;  %665 = vmatprep.mubr.msk.f32.mxu1 %vm780_vm0, %v779_v0 }
  0x43   :  { %663 = vmatprep.subr.mxu1 %v779_v0 }
  0x44   :  { %659 = vmatmul.mubr.f32.vlgmr.msra.gmra.mxu0 %v139_v11 }
  0x46   :  { %664 = vmatpush3.xpose.msra.mxu1 %v104_v8 }
  0x49   :  { %666 = vmatmul.mubr.f32.vlgmr.msra.gmra.mxu1 %v139_v11 }
  0xb3   :  { %v549_v48 = vpop.xlane.xlu0 %548 }
  0xb4   :  { %v550_v49 = vmul.f32 2.0, %v549_v48 }
  0xb6   :  { %v551_v50 = vmul.f32 1.442695, %v550_v49 }
  0xb7   :  { %v556_v51 = vpop.xlane.xlu0 %555 }
  0xb8   :  { %v557_v52 = vmul.f32 2.0, %v556_v51 }
  0xba   :  { %v558_v53 = vmul.f32 1.442695, %v557_v52 }
  0xf4   :  { %v145_v28 = vpop.f32.mrf.mxu0 }
  0xf6   :  { %v632_v29 = vpop.f32.mrf.mxu0 }
  0xf9   :  { %v226_v30 = vpop.f32.mrf.mxu1 }
  0xfa   :  { %v227_v33 = vadd.f32 %v226_v30, %v145_v28 }
  0xfb   :  { %v639_v31 = vpop.f32.mrf.mxu1 }
  0xfc   :  { %v302_v32 = vpop.f32.mrf.mxu0 }
  0xfd   :  { %v303_v36 = vadd.f32 %v302_v32, %v227_v33 }
  0xfe   :  { %v646_v34 = vpop.f32.mrf.mxu0 }
 0x101   :  { %v377_v35 = vpop.f32.mrf.mxu1 }
 0x102   :  { %v378_v38 = vadd.f32 %v377_v35, %v303_v36 }
 0x103   :  { %v653_v37 = vpop.f32.mrf.mxu1 }
 0x104   :  { %v454_v39 = vpop.f32.mrf.mxu0 }
 0x105   :  { %v455_v41 = vadd.f32 %v454_v39, %v378_v38 }
 0x106   :  { %v660_v40 = vpop.f32.mrf.mxu0 }
 0x109   :  { %v527_v42 = vpop.f32.mrf.mxu1 }
 0x10a   :  { %v528_v43 = vadd.f32 %v527_v42, %v455_v41 }
 0x10b   :  { %v667_v44 = vpop.f32.mrf.mxu1 }
 0x10c   :  { %v531_v45 = vmul.f32 1.442695, %v528_v43 }
 0x10e   :  { %678 = vpow2.f32 %v531_v45 }
 0x10f   :  { %680 = vpow2.f32 %v551_v50 }
 0x110   :  { %682 = vpow2.f32 %v558_v53 }
 0x11b   :  { %v679_v46 = vpop.eup %678 }
 0x11c   :  { %v535_v47 = vsel %vm534_vm3, %v679_v46, 0.0  ;;  %v681_v57 = vpop.eup %680 }
 0x11d   :  { %536 = vadd.xlane.f32.xlu1 %v535_v47  ;;  %v561_v58 = vmul.f32 2.0, %v681_v57  ;;  %v683_v61 = vpop.eup %682 }
 0x1a6   :  { %v537_v55 = vpop.xlane.xlu1 %536 }
 0x1a7   :  { %v538_v56 = vadd.f32 %v537_v55, %v533_v54 }
 0x1a9   :  { %540 = vst.msk [vmem:[#allocation2] sm:$0xff] %vm56_vm2, %v538_v56 }
 0x1b0   :  { %v560_v59 = vld [vmem:[#allocation2] sm:$0xff] }
 0x1b1   :  { %v562_v60 = vsub.f32 %v560_v59, %v561_v58 }
 0x1b3   :  { %v564_v62 = vmul.f32 0.071428575, %v562_v60 }
 0x1b5   :  { %v565_v63 = vadd.f32 %v683_v61, %v564_v62 }
 0x1b7   :  { %v566_v0 = vadd.f32 1e-08, %v565_v63 }
 0x1b9   :  { %684 = vrcp.f32 %v566_v0 }
 0x1c6   :  { %v685_v1 = vpop.eup %684 }
 0x1c7   :  { %v568_v2 = vmul.f32 %v685_v1, %v683_v61 }
 0x1c9   :  { %686 = vlog2.f32 %v568_v2 }
 0x1d6   :  { %v687_v3 = vpop.eup %686 }
 0x1d7   :  { %v570_v4 = vmul.f32 0.6931472, %v687_v3 }
 0x1d9   :  { %v571_v5 = vsub.f32 0.0, %v570_v4 }
 0x1db   :  { %v579_v6 = vsel %vm56_vm2, %v571_v5, 0.0 }
 0x1dc   :  { %580 = vadd.xlane.f32.xlu1 %v579_v6 }
 0x265   :  { %v581_v7 = vpop.xlane.xlu1 %580 }
 0x266   :  { %v582_v8 = vrot.slane %v581_v7, 4 }
 0x268   :  { %v583_v9 = vadd.f32 %v582_v8, %v581_v7 }
 0x26a   :  { %v584_v10 = vrot.slane %v583_v9, 2 }
 0x26c   :  { %v585_v11 = vadd.f32 %v584_v10, %v583_v9 }
 0x26e   :  { %v586_v12 = vrot.slane %v585_v11, 1 }
 0x270   :  { %v587_v13 = vadd.f32 %v586_v12, %v585_v11 }
 0x272   :  { %668 = vpush %v587_v13 }
 0x2a3   :  { %s669_s28 = spop %668 }
 0x2a4   :  { %v589_v14 = vstv %s669_s28 }
 0x2a5   :  { %591 = vst.msk [vmem:[#allocation9] sm:$0x1] %vm590_vm4, %v589_v14 }
 0x2a6   :  { %759 = shalt.err (!%p756_p5)
}
 0x2a7   :  { %601 = dma.vmem_to_hbm [thread:$0]  %s599_s2, 16, %s850_s3, [#allocation5]  }
 0x2a8   :  { %772 = dma.done.wait [#allocation5], 16  }
 0x2a9   :  { %773 = vsyncadd [#allocation5], 4294967280 }
 0x2aa   :  { %605 = vsyncpa [#allocation4], 1 }
 0x2ab   :  { %606 = vsyncpa [#allocation7], 1 }
 0x2ac   :  { %607 = vsyncpa [#allocation5], 1 }

</bundles_post_ra>
